<compile_context>
chip_gen: v6e
topology: v6e:2x2x1
jax: 0.10.0
libtpu: 0.0.40
codegen_flags: <defaults>
</compile_context>

<pallas_src>
import functools

import jax
import jax.numpy as jnp
from jax import lax
from jax.experimental import pallas as pl
from jax.experimental.pallas import tpu as pltpu


_SQRT_HALF = 0.7071067811865476


def _ffn_kernel(x_ref, ln_w_ref, ln_b_ref, w1_ref, b1_ref, w2_ref, b2_ref,
                o_ref, *, eps):
    # x tile: (tm, dim).  Elementwise math in f32; matmuls bf16 -> f32 accum.
    x = x_ref[...].astype(jnp.float32)

    # --- LayerNorm over last dim (torch.nn.LayerNorm(dim), eps=1e-5) ---
    mean = jnp.mean(x, axis=-1, keepdims=True)
    xc = x - mean
    var = jnp.mean(xc * xc, axis=-1, keepdims=True)
    xn = xc * lax.rsqrt(var + eps)
    xn = xn * ln_w_ref[...] + ln_b_ref[...]          # ln params are f32

    # --- Linear(dim -> hidden): bf16 x bf16 on the MXU, f32 accumulation ---
    h = jnp.dot(xn.astype(jnp.bfloat16), w1_ref[...],
                preferred_element_type=jnp.float32)
    h = h + b1_ref[...]                              # f32 bias

    # --- GELU (exact erf form: PyTorch nn.GELU() default) ---
    h = 0.5 * h * (1.0 + lax.erf(h * jnp.float32(_SQRT_HALF)))

    # --- Linear(hidden -> dim): bf16 x bf16 on the MXU, f32 accumulation ---
    y = jnp.dot(h.astype(jnp.bfloat16), w2_ref[...],
                preferred_element_type=jnp.float32)
    y = y + b2_ref[...]                              # f32 bias

    o_ref[...] = y.astype(o_ref.dtype)


def feedforward_pallas(x, params, *, tm=512, eps=1e-5, out_dtype=None,
                       vmem_limit_bytes=48 * 1024 * 1024):
    """x: (B, N, dim).  Returns (B, N, dim) in out_dtype (default x.dtype)."""
    ln_w, ln_b = params["ln_w"], params["ln_b"]
    w1, b1, w2, b2 = params["w1"], params["b1"], params["w2"], params["b2"]

    B, N, dim = x.shape
    hidden = w1.shape[1]
    M = B * N
    out_dtype = x.dtype if out_dtype is None else out_dtype

    # Row tile: multiple of 8 (sublane), capped so tiny M doesn't allocate a
    # huge mostly-empty block.  No padding: Pallas masks the partial tail
    # block (input reads only valid rows; output writes only valid rows).
    tm = max(8, min(int(tm), ((M + 7) // 8) * 8))
    num_tiles = pl.cdiv(M, tm)

    x2d = x.reshape(M, dim)

    # Weights in bf16 (MXU-native), cast exactly once here.
    w1_c = w1.astype(jnp.bfloat16)
    w2_c = w2.astype(jnp.bfloat16)
    # Elementwise params stay f32 (LayerNorm / bias math runs in f32 on VPU).
    ln_w2 = ln_w.reshape(1, dim).astype(jnp.float32)
    ln_b2 = ln_b.reshape(1, dim).astype(jnp.float32)
    b1_2 = b1.reshape(1, hidden).astype(jnp.float32)
    b2_2 = b2.reshape(1, dim).astype(jnp.float32)

    cost = pl.CostEstimate(
        flops=4 * M * dim * hidden + 10 * M * (dim + hidden),
        transcendentals=M * hidden,                       # erf (+ rsqrt)
        bytes_accessed=(M * dim * x2d.dtype.itemsize      # x in
                        + M * dim * jnp.dtype(out_dtype).itemsize  # y out
                        + 2 * dim * hidden * 2             # bf16 weights
                        + (2 * dim + hidden + dim) * 4),   # ln params + biases
    )

    out = pl.pallas_call(
        functools.partial(_ffn_kernel, eps=eps),
        out_shape=jax.ShapeDtypeStruct((M, dim), out_dtype),
        grid_spec=pltpu.PrefetchScalarGridSpec(
            num_scalar_prefetch=0,
            grid=(num_tiles,),
            in_specs=[
                pl.BlockSpec((tm, dim), lambda i: (i, 0)),      # x row tile
                pl.BlockSpec((1, dim), lambda i: (0, 0)),       # ln weight
                pl.BlockSpec((1, dim), lambda i: (0, 0)),       # ln bias
                pl.BlockSpec((dim, hidden), lambda i: (0, 0)),  # W1 (bf16, resident)
                pl.BlockSpec((1, hidden), lambda i: (0, 0)),    # b1
                pl.BlockSpec((hidden, dim), lambda i: (0, 0)),  # W2 (bf16, resident)
                pl.BlockSpec((1, dim), lambda i: (0, 0)),       # b2
            ],
            out_specs=pl.BlockSpec((tm, dim), lambda i: (i, 0)),
        ),
        compiler_params=pltpu.CompilerParams(
            dimension_semantics=("parallel",),
            vmem_limit_bytes=vmem_limit_bytes),
        cost_estimate=cost,
    )(x2d, ln_w2, ln_b2, w1_c, b1_2, w2_c, b2_2)

    return out.reshape(B, N, dim)


def init_params(key, dim, hidden_dim):
    """Deterministic synthetic params matching the torch module shapes.

    nn.LayerNorm(dim): weight (dim,), bias (dim,)
    nn.Linear(dim, hidden_dim): weight (hidden_dim, dim) -> stored transposed
    nn.Linear(hidden_dim, dim): weight (dim, hidden_dim) -> stored transposed
    """
    k1, k2, k3, k4 = jax.random.split(key, 4)
    bound1 = 1.0 / jnp.sqrt(dim)
    bound2 = 1.0 / jnp.sqrt(hidden_dim)
    return {
        "ln_w": jnp.ones((dim,), jnp.float32),
        "ln_b": jnp.zeros((dim,), jnp.float32),
        "w1": jax.random.uniform(k1, (dim, hidden_dim), jnp.float32,
                                 -bound1, bound1),
        "b1": jax.random.uniform(k2, (hidden_dim,), jnp.float32,
                                 -bound1, bound1),
        "w2": jax.random.uniform(k3, (hidden_dim, dim), jnp.float32,
                                 -bound2, bound2),
        "b2": jax.random.uniform(k4, (dim,), jnp.float32,
                                 -bound2, bound2),
    }


def _reference(x, p, eps=1e-5):
    mean = jnp.mean(x, axis=-1, keepdims=True)
    var = jnp.mean((x - mean) ** 2, axis=-1, keepdims=True)
    xn = (x - mean) / jnp.sqrt(var + eps) * p["ln_w"] + p["ln_b"]
    h = xn @ p["w1"] + p["b1"]
    h = 0.5 * h * (1.0 + lax.erf(h * jnp.float32(_SQRT_HALF)))
    return h @ p["w2"] + p["b2"]


if __name__ == "__main__":
    key = jax.random.PRNGKey(0)
    kx, kx2, kp = jax.random.split(key, 3)

    # Lane-dense shapes (dim, hidden multiples of 128).
    B, N, dim, hidden_dim = 2, 64, 128, 256
    x = jax.random.normal(kx, (B, N, dim), jnp.float32)
    params = init_params(kp, dim, hidden_dim)

    y = feedforward_pallas(x, params)
    y = jax.block_until_ready(y)
    y_ref = _reference(x, params)
    assert y.shape == (B, N, dim)
    # bf16 matmul operands with f32 accumulation: tolerance loosened vs the
    # pure-f32 reference.
    assert jnp.allclose(y, y_ref, atol=2e-2, rtol=2e-2), "mismatch vs reference"

    # Second call exercises the multi-tile grid with a masked partial tail
    # block (M = 140 rows, tm = 64 -> 3 tiles, last tile only 12 valid rows).
    B2, N2 = 2, 70
    x2 = jax.random.normal(kx2, (B2, N2, dim), jnp.float32)
    y2 = jax.block_until_ready(feedforward_pallas(x2, params, tm=64))
    y2_ref = _reference(x2, params)
    assert y2.shape == (B2, N2, dim)
    assert jnp.allclose(y2, y2_ref, atol=2e-2, rtol=2e-2), "tail-tile mismatch"

    print("KERNEL_OK")
</pallas_src>

<mosaic_0001>
module attributes {stable_mosaic.version = 11 : i64} {
  func.func @_ffn_kernel(%arg0: i32, %arg1: memref<128x128xf32, #tpu.memory_space<vmem>>, %arg2: memref<1x128xf32, #tpu.memory_space<vmem>>, %arg3: memref<1x128xf32, #tpu.memory_space<vmem>>, %arg4: memref<128x256xbf16, #tpu.memory_space<vmem>>, %arg5: memref<1x256xf32, #tpu.memory_space<vmem>>, %arg6: memref<256x128xbf16, #tpu.memory_space<vmem>>, %arg7: memref<1x128xf32, #tpu.memory_space<vmem>>, %arg8: memref<128x128xf32, #tpu.memory_space<vmem>>) attributes {dimension_semantics = [#tpu.dimension_semantics<parallel>], iteration_bounds = array<i64: 1>, scalar_prefetch = 0 : i64, scratch_operands = 0 : i64, tpu.core_type = #tpu.core_type<tc>, window_params = [{transform_indices = @transform_0, window_bounds = array<i64: 128, 128>}, {pipeline_mode = #tpu.pipeline_mode<synchronous>, transform_indices = @transform_1, window_bounds = array<i64: 1, 128>}, {pipeline_mode = #tpu.pipeline_mode<synchronous>, transform_indices = @transform_2, window_bounds = array<i64: 1, 128>}, {pipeline_mode = #tpu.pipeline_mode<synchronous>, transform_indices = @transform_3, window_bounds = array<i64: 128, 256>}, {pipeline_mode = #tpu.pipeline_mode<synchronous>, transform_indices = @transform_4, window_bounds = array<i64: 1, 256>}, {pipeline_mode = #tpu.pipeline_mode<synchronous>, transform_indices = @transform_5, window_bounds = array<i64: 256, 128>}, {pipeline_mode = #tpu.pipeline_mode<synchronous>, transform_indices = @transform_6, window_bounds = array<i64: 1, 128>}, {transform_indices = @transform_7, window_bounds = array<i64: 128, 128>}]} {
    %c0 = arith.constant 0 : index
    %c0_0 = arith.constant 0 : index
    %0 = vector.load %arg1[%c0, %c0_0] : memref<128x128xf32, #tpu.memory_space<vmem>>, vector<128x128xf32>
    %cst = arith.constant dense<0.000000e+00> : vector<128xf32>
    %1 = vector.multi_reduction <add>, %0, %cst [1] : vector<128x128xf32> to vector<128xf32>
    %2 = vector.shape_cast %1 : vector<128xf32> to vector<128x1xf32>
    %cst_1 = arith.constant 1.280000e+02 : f32
    %3 = vector.broadcast %cst_1 : f32 to vector<128x1xf32>
    %4 = arith.divf %2, %3 : vector<128x1xf32>
    %5 = vector.broadcast %4 : vector<128x1xf32> to vector<128x128xf32>
    %6 = arith.subf %0, %5 : vector<128x128xf32>
    %7 = arith.mulf %6, %6 : vector<128x128xf32>
    %cst_2 = arith.constant dense<0.000000e+00> : vector<128xf32>
    %8 = vector.multi_reduction <add>, %7, %cst_2 [1] : vector<128x128xf32> to vector<128xf32>
    %9 = vector.shape_cast %8 : vector<128xf32> to vector<128x1xf32>
    %cst_3 = arith.constant 1.280000e+02 : f32
    %10 = vector.broadcast %cst_3 : f32 to vector<128x1xf32>
    %11 = arith.divf %9, %10 : vector<128x1xf32>
    %cst_4 = arith.constant 9.99999974E-6 : f32
    %12 = vector.broadcast %cst_4 : f32 to vector<128x1xf32>
    %13 = arith.addf %11, %12 : vector<128x1xf32>
    %14 = math.rsqrt %13 : vector<128x1xf32>
    %15 = vector.broadcast %14 : vector<128x1xf32> to vector<128x128xf32>
    %16 = arith.mulf %6, %15 : vector<128x128xf32>
    %c0_5 = arith.constant 0 : index
    %c0_6 = arith.constant 0 : index
    %17 = vector.load %arg2[%c0_5, %c0_6] : memref<1x128xf32, #tpu.memory_space<vmem>>, vector<1x128xf32>
    %18 = vector.broadcast %17 : vector<1x128xf32> to vector<128x128xf32>
    %19 = arith.mulf %16, %18 : vector<128x128xf32>
    %c0_7 = arith.constant 0 : index
    %c0_8 = arith.constant 0 : index
    %20 = vector.load %arg3[%c0_7, %c0_8] : memref<1x128xf32, #tpu.memory_space<vmem>>, vector<1x128xf32>
    %21 = vector.broadcast %20 : vector<1x128xf32> to vector<128x128xf32>
    %22 = arith.addf %19, %21 : vector<128x128xf32>
    %23 = arith.truncf %22 : vector<128x128xf32> to vector<128x128xbf16>
    %c0_9 = arith.constant 0 : index
    %c0_10 = arith.constant 0 : index
    %24 = vector.load %arg4[%c0_9, %c0_10] : memref<128x256xbf16, #tpu.memory_space<vmem>>, vector<128x256xbf16>
    %cst_11 = arith.constant dense<0.000000e+00> : vector<128x256xf32>
    %25 = tpu.matmul %23, %24, %cst_11 {dimension_numbers = #tpu.dot_dimension_numbers<[1], [0], [0], [1], [0, 0, 1, 1], [], []>} : vector<128x128xbf16>, vector<128x256xbf16>, vector<128x256xf32> -> vector<128x256xf32>
    %c0_12 = arith.constant 0 : index
    %c0_13 = arith.constant 0 : index
    %26 = vector.load %arg5[%c0_12, %c0_13] : memref<1x256xf32, #tpu.memory_space<vmem>>, vector<1x256xf32>
    %27 = vector.broadcast %26 : vector<1x256xf32> to vector<128x256xf32>
    %28 = arith.addf %25, %27 : vector<128x256xf32>
    %cst_14 = arith.constant 5.000000e-01 : f32
    %29 = vector.broadcast %cst_14 : f32 to vector<128x256xf32>
    %30 = arith.mulf %29, %28 : vector<128x256xf32>
    %cst_15 = arith.constant 0.707106769 : f32
    %31 = vector.broadcast %cst_15 : f32 to vector<128x256xf32>
    %32 = arith.mulf %28, %31 : vector<128x256xf32>
    %33 = math.erf %32 : vector<128x256xf32>
    %cst_16 = arith.constant 1.000000e+00 : f32
    %34 = vector.broadcast %cst_16 : f32 to vector<128x256xf32>
    %35 = arith.addf %34, %33 : vector<128x256xf32>
    %36 = arith.mulf %30, %35 : vector<128x256xf32>
    %37 = arith.truncf %36 : vector<128x256xf32> to vector<128x256xbf16>
    %c0_17 = arith.constant 0 : index
    %c0_18 = arith.constant 0 : index
    %38 = vector.load %arg6[%c0_17, %c0_18] : memref<256x128xbf16, #tpu.memory_space<vmem>>, vector<256x128xbf16>
    %cst_19 = arith.constant dense<0.000000e+00> : vector<128x128xf32>
    %39 = tpu.matmul %37, %38, %cst_19 {dimension_numbers = #tpu.dot_dimension_numbers<[1], [0], [0], [1], [0, 0, 1, 1], [], []>} : vector<128x256xbf16>, vector<256x128xbf16>, vector<128x128xf32> -> vector<128x128xf32>
    %c0_20 = arith.constant 0 : index
    %c0_21 = arith.constant 0 : index
    %40 = vector.load %arg7[%c0_20, %c0_21] : memref<1x128xf32, #tpu.memory_space<vmem>>, vector<1x128xf32>
    %41 = vector.broadcast %40 : vector<1x128xf32> to vector<128x128xf32>
    %42 = arith.addf %39, %41 : vector<128x128xf32>
    %c0_22 = arith.constant 0 : index
    %c0_23 = arith.constant 0 : index
    %43 = vector.load %arg8[%c0_22, %c0_23] : memref<128x128xf32, #tpu.memory_space<vmem>>, vector<128x128xf32>
    tpu.vector_store %arg8[%c0_22, %c0_23], %42 {strides = array<i32>} : memref<128x128xf32, #tpu.memory_space<vmem>>, vector<128x128xf32>,
    return
  }
  func.func @transform_0(%arg0: i32) -> (i32, i32) {
    %c0_i32 = arith.constant 0 : i32
    %c0_i32_0 = arith.constant 0 : i32
    return %arg0, %c0_i32 : i32, i32
  }
  func.func @transform_1(%arg0: i32) -> (i32, i32) {
    %c0_i32 = arith.constant 0 : i32
    %c0_i32_0 = arith.constant 0 : i32
    %c0_i32_1 = arith.constant 0 : i32
    return %c0_i32, %c0_i32_0 : i32, i32
  }
  func.func @transform_2(%arg0: i32) -> (i32, i32) {
    %c0_i32 = arith.constant 0 : i32
    %c0_i32_0 = arith.constant 0 : i32
    %c0_i32_1 = arith.constant 0 : i32
    return %c0_i32, %c0_i32_0 : i32, i32
  }
  func.func @transform_3(%arg0: i32) -> (i32, i32) {
    %c0_i32 = arith.constant 0 : i32
    %c0_i32_0 = arith.constant 0 : i32
    %c0_i32_1 = arith.constant 0 : i32
    return %c0_i32, %c0_i32_0 : i32, i32
  }
  func.func @transform_4(%arg0: i32) -> (i32, i32) {
    %c0_i32 = arith.constant 0 : i32
    %c0_i32_0 = arith.constant 0 : i32
    %c0_i32_1 = arith.constant 0 : i32
    return %c0_i32, %c0_i32_0 : i32, i32
  }
  func.func @transform_5(%arg0: i32) -> (i32, i32) {
    %c0_i32 = arith.constant 0 : i32
    %c0_i32_0 = arith.constant 0 : i32
    %c0_i32_1 = arith.constant 0 : i32
    return %c0_i32, %c0_i32_0 : i32, i32
  }
  func.func @transform_6(%arg0: i32) -> (i32, i32) {
    %c0_i32 = arith.constant 0 : i32
    %c0_i32_0 = arith.constant 0 : i32
    %c0_i32_1 = arith.constant 0 : i32
    return %c0_i32, %c0_i32_0 : i32, i32
  }
  func.func @transform_7(%arg0: i32) -> (i32, i32) {
    %c0_i32 = arith.constant 0 : i32
    %c0_i32_0 = arith.constant 0 : i32
    return %arg0, %c0_i32 : i32, i32
  }
}

</mosaic_0001>

<bundles_post_ra>
// kernel: tpu_custom_call.1
= control target key start
LH: loop header
LB: loop body
LE: loop exit
PB: predicated region body
PF: predicated region fallthrough
CT: control target
= control target key end

     0   :  { %12 = vsyncpa [#allocation3], 0  ;;  %s1734_s0 = inlined_call_operand.hbm [shape: f32[128,128], index: 0, kind: input, shape index: {}]   ;;  %s1735_s1 = inlined_call_operand.vmem [shape: f32[1,128], index: 1, kind: input, shape index: {}]   ;;  %s1736_s2 = inlined_call_operand.hbm [shape: f32[1,128], index: 2, kind: input, shape index: {}]   ;;  %s1737_s3 = inlined_call_operand.hbm [shape: bf16[128,256], index: 3, kind: input, shape index: {}]   ;;  %s1738_s4 = inlined_call_operand.vmem [shape: f32[1,256], index: 4, kind: input, shape index: {}]   ;;  %s1739_s5 = inlined_call_operand.hbm [shape: bf16[256,128], index: 5, kind: input, shape index: {}]   ;;  %s1740_s6 = inlined_call_operand.vmem [shape: f32[1,128], index: 6, kind: input, shape index: {}]   ;;  %s1741_s7 = inlined_call_operand.hbm [shape: f32[128,128], index: 7, kind: output, shape index: {}]  }
   0x1   :  { %13 = vsyncpa [#allocation6], 0 }
   0x2   :  { %14 = vsyncpa [#allocation9], 0 }
   0x3   :  { %15 = vsyncpa [#allocation4], 0  ;;  %s1345_s24 = smov [#allocation5]   ;;  %s1346_s26 = smov [#allocation2]  }
   0x4   :  { %s36_s25 = sshll.u32 %s1345_s24, 4  ;;  %s21_s27 = sshll.u32 %s1346_s26, 4  ;;  %s37_s25 = int_to_ptr.vmem [resolvable:$true] %s36_s25  ;;  %s22_s27 = int_to_ptr.vmem [resolvable:$true] %s21_s27 }
   0x5   :  { %s1245_s28 = scalar_lea.vmem %s37_s25, 16  ;;  %s1249_s29 = scalar_lea.vmem %s37_s25, 32 }
   0x6   :  { %p1246_p0 = scmp.ne.s32.totalorder %s37_s25, %s1245_s28  ;;  %p1250_p1 = scmp.lt.s32.totalorder %s37_s25, %s37_s25 }
   0x7   :  { %p1251_p2 = scmp.lt.s32.totalorder %s1249_s29, %s1245_s28 }
   0x9   :  { %p1252_p3 = por %p1251_p2, %p1250_p1 }
   0xb   :  { %p1253_p4 = pnand %p1252_p3, %p1246_p0 }
   0xd   :  { %1256 = shalt.err (!%p1253_p4)
}
   0xe   :  { %39 = dma.hbm_to_vmem [thread:$0]  %s1736_s2, 16, %s37_s25, [#allocation6]  }
   0xf   :  { %s1265_s9 = scalar_lea.vmem %s22_s27, 2048  ;;  %p1270_p6 = scmp.lt.s32.totalorder %s22_s27, %s22_s27 }
  0x10   :  { %p1266_p5 = scmp.ne.s32.totalorder %s22_s27, %s1265_s9  ;;  %p1271_p7 = scmp.lt.s32.totalorder %s1265_s9, %s1265_s9 }
  0x12   :  { %p1272_p8 = por %p1271_p7, %p1270_p6 }
  0x14   :  { %p1273_p9 = pnand %p1272_p8, %p1266_p5 }
  0x16   :  { %1276 = shalt.err (!%p1273_p9)
}
  0x17   :  { %s1347_s10 = smov 128   ;;  %s1348_s11 = smov 8  }
  0x18   :  { %27 = dma.hbm_to_vmem [thread:$0]  %s1734_s0, 2048, %s22_s27, [#allocation3], %s1347_s10, %s1347_s10, %s1348_s11  }
  0x19   :  { %s1349_s14 = smov [#allocation7]   ;;  %s1350_s16 = smov [#allocation8]  }
  0x1a   :  { %s45_s15 = sshll.u32 %s1349_s14, 4  ;;  %s59_s2 = sshll.u32 %s1350_s16, 4  ;;  %s46_s15 = int_to_ptr.vmem [resolvable:$true] %s45_s15  ;;  %s60_s2 = int_to_ptr.vmem [resolvable:$true] %s59_s2 }
  0x1b   :  { %s1285_s17 = scalar_lea.vmem %s46_s15, 2048  ;;  %p1290_p11 = scmp.lt.s32.totalorder %s46_s15, %s46_s15 }
  0x1c   :  { %p1286_p10 = scmp.ne.s32.totalorder %s46_s15, %s1285_s17  ;;  %p1291_p12 = scmp.lt.s32.totalorder %s1285_s17, %s1285_s17 }
  0x1e   :  { %p1292_p13 = por %p1291_p12, %p1290_p11 }
  0x20   :  { %p1293_p0 = pnand %p1292_p13, %p1286_p10 }
  0x22   :  { %1296 = shalt.err (!%p1293_p0)
}
  0x23   :  { %51 = dma.hbm_to_vmem [thread:$0]  %s1737_s3, 2048, %s46_s15, [#allocation6], %s1347_s10, %s1347_s10, %s1348_s11  }
  0x24   :  { %s1305_s0 = scalar_lea.vmem %s60_s2, 2048  ;;  %p1310_p2 = scmp.lt.s32.totalorder %s60_s2, %s60_s2 }
  0x25   :  { %p1306_p1 = scmp.ne.s32.totalorder %s60_s2, %s1305_s0  ;;  %p1311_p3 = scmp.lt.s32.totalorder %s1305_s0, %s1305_s0 }
  0x27   :  { %p1312_p4 = por %p1311_p3, %p1310_p2 }
  0x29   :  { %p1313_p5 = pnand %p1312_p4, %p1306_p1 }
  0x2b   :  { %1316 = shalt.err (!%p1313_p5)
}
  0x2c   :  { %s1351_s20 = smov 64   ;;  %s1352_s21 = smov 4  }
  0x2d   :  { %65 = dma.hbm_to_vmem [thread:$0]  %s1739_s5, 2048, %s60_s2, [#allocation9], %s1351_s20, %s1351_s20, %s1352_s21  }
  0x2e   :  { %1337 = dma.done.wait [#allocation3], 2048  }
  0x2f   :  { %1338 = vsyncadd [#allocation3], 4294965248 }
  0x30   :  { %1339 = dma.done.wait [#allocation6], 2064  }
  0x31   :  { %1340 = vsyncadd [#allocation6], 4294965232 }
  0x32   :  { %1341 = dma.done.wait [#allocation9], 2048  }
  0x33   :  { %1342 = vsyncadd [#allocation9], 4294965248  ;;  %v81_v0 = vld [vmem:[#allocation2] sm:$0xff]  ;;  %v83_v1 = vld [vmem:[#allocation2 + $0x10] sm:$0xff] }
  0x34   :  { %97 = vadd.xlane.f32.xlu0 %v81_v0  ;;  %101 = vadd.xlane.f32.xlu1 %v83_v1  ;;  %v82_v2 = vld [vmem:[#allocation2 + $0x8] sm:$0xff]  ;;  %v84_v3 = vld [vmem:[#allocation2 + $0x18] sm:$0xff]  ;;  %v85_v4 = vld [vmem:[#allocation2 + $0x20] sm:$0xff] }
  0x35   :  { %v86_v5 = vld [vmem:[#allocation2 + $0x28] sm:$0xff]  ;;  %v87_v6 = vld [vmem:[#allocation2 + $0x30] sm:$0xff]  ;;  %v88_v7 = vld [vmem:[#allocation2 + $0x38] sm:$0xff] }
  0x36   :  { %v1413_v8 = vld [vmem:[#allocation2 + $0x40] sm:$0xff]  ;;  %v1415_v9 = vld [vmem:[#allocation2 + $0x48] sm:$0xff]  ;;  %v1417_v10 = vld [vmem:[#allocation2 + $0x50] sm:$0xff] }
  0x37   :  { %v1419_v11 = vld [vmem:[#allocation2 + $0x58] sm:$0xff]  ;;  %v1425_v12 = vld [vmem:[#allocation2 + $0x60] sm:$0xff]  ;;  %v1427_v13 = vld [vmem:[#allocation2 + $0x68] sm:$0xff] }
  0x38   :  { %99 = vadd.xlane.f32.xlu0 %v82_v2  ;;  %103 = vadd.xlane.f32.xlu1 %v84_v3  ;;  %v1431_v14 = vld [vmem:[#allocation2 + $0x70] sm:$0xff]  ;;  %v1433_v15 = vld [vmem:[#allocation2 + $0x78] sm:$0xff]  ;;  %v1106_v54 = vld [vmem:[#allocation7 + $0x60] ss:$8 sps:$4 sm:$0xff]  }
  0x39   :  { %v1101_v16 = vld [vmem:[#allocation7 + $0x74] ss:$8 sps:$4 sm:$0xff]   ;;  %v1103_v17 = vld [vmem:[#allocation7 + $0x70] ss:$8 sps:$4 sm:$0xff]   ;;  %v1104_v53 = vld [vmem:[#allocation7 + $0x64] ss:$8 sps:$4 sm:$0xff]  }
  0x3a   :  { %436 = vmatprep.subr.bf16.mxu0 %v1101_v16  ;;  %v1107_v63 = vld [vmem:[#allocation7 + $0x54] ss:$8 sps:$4 sm:$0xff]  }
  0x3b   :  { %437 = vmatpush1.bf16.msra.mxu0 %v1103_v17  ;;  %v1112_v17 = vld [vmem:[#allocation7 + $0x40] ss:$8 sps:$4 sm:$0xff]  }
  0x3c   :  { %105 = vadd.xlane.f32.xlu0 %v85_v4  ;;  %107 = vadd.xlane.f32.xlu1 %v86_v5 }
  0x3d   :  { %438 = vmatprep.subr.bf16.mxu0 %v1104_v53 }
  0x3f   :  { %439 = vmatpush1.bf16.msra.mxu0 %v1106_v54 }
  0x40   :  { %109 = vadd.xlane.f32.xlu0 %v87_v6  ;;  %111 = vadd.xlane.f32.xlu1 %v88_v7 }
  0x41   :  { %440 = vmatprep.subr.bf16.mxu0 %v1107_v63 }
  0x44   :  { %113 = vadd.xlane.f32.xlu0 %v1413_v8  ;;  %115 = vadd.xlane.f32.xlu1 %v1415_v9 }
  0x48   :  { %117 = vadd.xlane.f32.xlu0 %v1417_v10  ;;  %119 = vadd.xlane.f32.xlu1 %v1419_v11 }
  0x4c   :  { %121 = vadd.xlane.f32.xlu0 %v1425_v12  ;;  %123 = vadd.xlane.f32.xlu1 %v1427_v13 }
  0x50   :  { %125 = vadd.xlane.f32.xlu0 %v1431_v14  ;;  %127 = vadd.xlane.f32.xlu1 %v1433_v15 }
  0xbd   :  { %v98_v18 = vpop.xlane.xlu0 %97  ;;  %v102_v19 = vpop.xlane.xlu1 %101 }
  0xbe   :  { %v130_v20 = vmul.f32 0.0078125, %v98_v18  ;;  %v132_v21 = vmul.f32 0.0078125, %v102_v19 }
  0xc0   :  { %v1437_v22 = vsub.f32 %v81_v0, %v130_v20  ;;  %v1439_v23 = vsub.f32 %v83_v1, %v132_v21 }
  0xc1   :  { %v100_v24 = vpop.xlane.xlu0 %99  ;;  %v104_v25 = vpop.xlane.xlu1 %103 }
  0xc2   :  { %v131_v26 = vmul.f32 0.0078125, %v100_v24  ;;  %v162_v27 = vmul.f32 %v1437_v22, %v1437_v22  ;;  %v133_v28 = vmul.f32 0.0078125, %v104_v25  ;;  %v164_v31 = vmul.f32 %v1439_v23, %v1439_v23 }
  0xc4   :  { %v1443_v29 = vsub.f32 %v82_v2, %v131_v26  ;;  %178 = vadd.xlane.f32.xlu0 %v162_v27  ;;  %v1445_v30 = vsub.f32 %v84_v3, %v133_v28  ;;  %v1109_v3 = vld [vmem:[#allocation7 + $0x50] ss:$8 sps:$4 sm:$0xff]  }
  0xc5   :  { %v106_v32 = vpop.xlane.xlu0 %105  ;;  %v108_v33 = vpop.xlane.xlu1 %107  ;;  %441 = vmatpush1.bf16.msra.mxu0 %v1109_v3  ;;  %v1115_v27 = vld [vmem:[#allocation7 + $0x30] ss:$8 sps:$4 sm:$0xff]  }
  0xc6   :  { %v134_v34 = vmul.f32 0.0078125, %v106_v32  ;;  %v163_v35 = vmul.f32 %v1443_v29, %v1443_v29  ;;  %v135_v36 = vmul.f32 0.0078125, %v108_v33  ;;  %v165_v39 = vmul.f32 %v1445_v30, %v1445_v30  ;;  %v1118_v32 = vld [vmem:[#allocation7 + $0x20] ss:$8 sps:$4 sm:$0xff]   ;;  %v1121_v33 = vld [vmem:[#allocation7 + $0x10] ss:$8 sps:$4 sm:$0xff]  }
  0xc8   :  { %v1451_v37 = vsub.f32 %v85_v4, %v134_v34  ;;  %182 = vadd.xlane.f32.xlu0 %v164_v31  ;;  %180 = vadd.xlane.f32.xlu1 %v163_v35  ;;  %v1453_v38 = vsub.f32 %v86_v5, %v135_v36  ;;  %v1116_v31 = vld [vmem:[#allocation7 + $0x24] ss:$8 sps:$4 sm:$0xff]   ;;  %v1124_v35 = vld [vmem:[#allocation7] ss:$8 sps:$4 sm:$0xff]   ;;  %v1353_v36 = vmov 0  }
  0xc9   :  { %v110_v40 = vpop.xlane.xlu0 %109  ;;  %v112_v41 = vpop.xlane.xlu1 %111  ;;  %v1122_v34 = vld [vmem:[#allocation7 + $0x4] ss:$8 sps:$4 sm:$0xff]   ;;  %468 = vmatprep.mubr.bf16.mxu0 %v1353_v36 }
  0xca   :  { %v136_v42 = vmul.f32 0.0078125, %v110_v40  ;;  %v166_v43 = vmul.f32 %v1451_v37, %v1451_v37  ;;  %v137_v44 = vmul.f32 0.0078125, %v112_v41  ;;  %v167_v47 = vmul.f32 %v1453_v38, %v1453_v38 }
  0xcc   :  { %v1459_v45 = vsub.f32 %v87_v6, %v136_v42  ;;  %184 = vadd.xlane.f32.xlu1 %v165_v39  ;;  %186 = vadd.xlane.f32.xlu0 %v166_v43  ;;  %v1461_v46 = vsub.f32 %v88_v7, %v137_v44 }
  0xcd   :  { %v114_v48 = vpop.xlane.xlu0 %113  ;;  %v116_v49 = vpop.xlane.xlu1 %115 }
  0xce   :  { %v138_v50 = vmul.f32 0.0078125, %v114_v48  ;;  %v168_v51 = vmul.f32 %v1459_v45, %v1459_v45  ;;  %v139_v52 = vmul.f32 0.0078125, %v116_v49  ;;  %v169_v57 = vmul.f32 %v1461_v46, %v1461_v46 }
  0xd0   :  { %v1468_v55 = vsub.f32 %v1413_v8, %v138_v50  ;;  %188 = vadd.xlane.f32.xlu1 %v167_v47  ;;  %190 = vadd.xlane.f32.xlu0 %v168_v51  ;;  %v1471_v56 = vsub.f32 %v1415_v9, %v139_v52  ;;  %v1110_v9 = vld [vmem:[#allocation7 + $0x44] ss:$8 sps:$4 sm:$0xff]  }
  0xd1   :  { %v118_v58 = vpop.xlane.xlu0 %117  ;;  %v120_v59 = vpop.xlane.xlu1 %119  ;;  %442 = vmatprep.subr.bf16.mxu0 %v1110_v9 }
  0xd2   :  { %v140_v60 = vmul.f32 0.0078125, %v118_v58  ;;  %v170_v61 = vmul.f32 %v1468_v55, %v1468_v55  ;;  %v141_v62 = vmul.f32 0.0078125, %v120_v59  ;;  %v171_v2 = vmul.f32 %v1471_v56, %v1471_v56  ;;  %443 = vmatpush1.bf16.msra.mxu0 %v1112_v17 }
  0xd4   :  { %v1478_v0 = vsub.f32 %v1417_v10, %v140_v60  ;;  %192 = vadd.xlane.f32.xlu1 %v169_v57  ;;  %194 = vadd.xlane.f32.xlu0 %v170_v61  ;;  %v1481_v1 = vsub.f32 %v1419_v11, %v141_v62 }
  0xd5   :  { %v122_v4 = vpop.xlane.xlu0 %121  ;;  %v124_v5 = vpop.xlane.xlu1 %123 }
  0xd6   :  { %v142_v6 = vmul.f32 0.0078125, %v122_v4  ;;  %v172_v7 = vmul.f32 %v1478_v0, %v1478_v0  ;;  %v143_v8 = vmul.f32 0.0078125, %v124_v5  ;;  %v173_v16 = vmul.f32 %v1481_v1, %v1481_v1  ;;  %v1514_v5 = vld [vmem:[%s1735_s1] ss:$0 sm:$0xff] }
  0xd8   :  { %v1488_v10 = vsub.f32 %v1425_v12, %v142_v6  ;;  %196 = vadd.xlane.f32.xlu1 %v171_v2  ;;  %198 = vadd.xlane.f32.xlu0 %v172_v7  ;;  %v1491_v11 = vsub.f32 %v1427_v13, %v143_v8  ;;  %v1113_v12 = vld [vmem:[#allocation7 + $0x34] ss:$8 sps:$4 sm:$0xff]  }
  0xd9   :  { %v126_v18 = vpop.xlane.xlu0 %125  ;;  %v128_v19 = vpop.xlane.xlu1 %127  ;;  %444 = vmatprep.subr.bf16.mxu0 %v1113_v12 }
  0xda   :  { %v144_v20 = vmul.f32 0.0078125, %v126_v18  ;;  %v174_v21 = vmul.f32 %v1488_v10, %v1488_v10  ;;  %v145_v24 = vmul.f32 0.0078125, %v128_v19  ;;  %v175_v26 = vmul.f32 %v1491_v11, %v1491_v11  ;;  %445 = vmatpush1.bf16.msra.mxu0 %v1115_v27 }
  0xdb   :  { %446 = vmatprep.subr.bf16.mxu0 %v1116_v31 }
  0xdc   :  { %v1498_v25 = vsub.f32 %v1431_v14, %v144_v20  ;;  %200 = vadd.xlane.f32.xlu1 %v173_v16  ;;  %202 = vadd.xlane.f32.xlu0 %v174_v21  ;;  %v1501_v13 = vsub.f32 %v1433_v15, %v145_v24  ;;  %v1119_v15 = vld [vmem:[#allocation7 + $0x14] ss:$8 sps:$4 sm:$0xff]  }
  0xdd   :  { %v1518_v20 = vld [vmem:[#allocation5] ss:$0 sm:$0xff] }
  0xde   :  { %v176_v28 = vmul.f32 %v1498_v25, %v1498_v25  ;;  %v177_v14 = vmul.f32 %v1501_v13, %v1501_v13  ;;  %447 = vmatpush1.bf16.msra.mxu0 %v1118_v32 }
  0xdf   :  { %448 = vmatprep.subr.bf16.mxu0 %v1119_v15 }
  0xe0   :  { %204 = vadd.xlane.f32.xlu1 %v175_v26  ;;  %206 = vadd.xlane.f32.xlu0 %v176_v28 }
  0xe2   :  { %449 = vmatpush1.bf16.msra.mxu0 %v1121_v33 }
  0xe3   :  { %450 = vmatprep.subr.bf16.mxu0 %v1122_v34 }
  0xe4   :  { %208 = vadd.xlane.f32.xlu1 %v177_v14 }
  0xe6   :  { %451 = vmatpush1.bf16.msra.mxu0 %v1124_v35 }
 0x14d   :  { %v179_v39 = vpop.xlane.xlu0 %178 }
 0x14e   :  { %v210_v40 = vmul.f32 0.0078125, %v179_v39 }
 0x150   :  { %v226_v41 = vadd.f32 1e-05, %v210_v40 }
 0x151   :  { %v181_v42 = vpop.xlane.xlu1 %180  ;;  %v183_v43 = vpop.xlane.xlu0 %182 }
 0x152   :  { %1141 = vrsqrt.f32 %v226_v41  ;;  %v211_v44 = vmul.f32 0.0078125, %v181_v42  ;;  %v212_v47 = vmul.f32 0.0078125, %v183_v43 }
 0x154   :  { %v227_v48 = vadd.f32 1e-05, %v211_v44  ;;  %v228_v49 = vadd.f32 1e-05, %v212_v47 }
 0x155   :  { %v185_v50 = vpop.xlane.xlu1 %184  ;;  %v187_v51 = vpop.xlane.xlu0 %186 }
 0x156   :  { %1143 = vrsqrt.f32 %v227_v48  ;;  %v213_v52 = vmul.f32 0.0078125, %v185_v50  ;;  %v214_v54 = vmul.f32 0.0078125, %v187_v51 }
 0x157   :  { %1145 = vrsqrt.f32 %v228_v49 }
 0x158   :  { %v229_v53 = vadd.f32 1e-05, %v213_v52  ;;  %v230_v59 = vadd.f32 1e-05, %v214_v54 }
 0x159   :  { %v189_v57 = vpop.xlane.xlu1 %188  ;;  %v191_v61 = vpop.xlane.xlu0 %190 }
 0x15a   :  { %1147 = vrsqrt.f32 %v229_v53  ;;  %v215_v58 = vmul.f32 0.0078125, %v189_v57  ;;  %v216_v3 = vmul.f32 0.0078125, %v191_v61 }
 0x15c   :  { %v231_v60 = vadd.f32 1e-05, %v215_v58  ;;  %v232_v8 = vadd.f32 1e-05, %v216_v3 }
 0x15d   :  { %v193_v62 = vpop.xlane.xlu1 %192  ;;  %v195_v16 = vpop.xlane.xlu0 %194 }
 0x15e   :  { %1149 = vrsqrt.f32 %v231_v60  ;;  %v217_v63 = vmul.f32 0.0078125, %v193_v62  ;;  %v218_v12 = vmul.f32 0.0078125, %v195_v16 }
 0x15f   :  { %v1142_v2 = vpop.eup %1141  ;;  %1151 = vrsqrt.f32 %v230_v59 }
 0x160   :  { %v258_v4 = vmul.f32 %v1142_v2, %v1437_v22  ;;  %v233_v6 = vadd.f32 1e-05, %v217_v63  ;;  %v234_v34 = vadd.f32 1e-05, %v218_v12 }
 0x161   :  { %v197_v9 = vpop.xlane.xlu1 %196  ;;  %v199_v40 = vpop.xlane.xlu0 %198 }
 0x162   :  { %v281_v18 = vmul.f32 %v1514_v5, %v258_v4  ;;  %1153 = vrsqrt.f32 %v233_v6  ;;  %v219_v21 = vmul.f32 0.0078125, %v197_v9  ;;  %v220_v42 = vmul.f32 0.0078125, %v199_v40 }
 0x163   :  { %v1144_v7 = vpop.eup %1143  ;;  %1155 = vrsqrt.f32 %v232_v8 }
 0x164   :  { %v259_v17 = vmul.f32 %v1144_v7, %v1443_v29  ;;  %v1146_v19 = vpop.eup %1145  ;;  %v304_v26 = vadd.f32 %v1518_v20, %v281_v18  ;;  %v235_v31 = vadd.f32 1e-05, %v219_v21  ;;  %v236_v53 = vadd.f32 1e-05, %v220_v42 }
 0x165   :  { %v260_v28 = vmul.f32 %v1146_v19, %v1439_v23  ;;  %v201_v15 = vpop.xlane.xlu1 %200  ;;  %v203_v57 = vpop.xlane.xlu0 %202 }
 0x166   :  { %v282_v22 = vmul.f32 %v1514_v5, %v259_v17  ;;  %1157 = vrsqrt.f32 %v235_v31  ;;  %v221_v41 = vmul.f32 0.0078125, %v201_v15  ;;  %v222_v59 = vmul.f32 0.0078125, %v203_v57  ;;  %v1129_v57 = vld [vmem:[#allocation8 + $0x68] sm:$0xff]  }
 0x167   :  { %v1148_v24 = vpop.eup %1147  ;;  %v283_v35 = vmul.f32 %v1514_v5, %v260_v28  ;;  %1159 = vrsqrt.f32 %v234_v34 }
 0x168   :  { %v305_v27 = vadd.f32 %v1518_v20, %v282_v22  ;;  %v261_v29 = vmul.f32 %v1148_v24, %v1445_v30  ;;  %v237_v47 = vadd.f32 1e-05, %v221_v41  ;;  %v238_v6 = vadd.f32 1e-05, %v222_v59  ;;  %v1136_v59 = vld [vmem:[#allocation8 + $0x10] sm:$0xff]  }
 0x169   :  { %v306_v43 = vadd.f32 %v1518_v20, %v283_v35  ;;  %v205_v51 = vpop.xlane.xlu1 %204  ;;  %v207_v9 = vpop.xlane.xlu0 %206 }
 0x16a   :  { %v320_v14 = vpack.c.bf16 %v305_v27, %v304_v26  ;;  %v284_v33 = vmul.f32 %v1514_v5, %v261_v29  ;;  %1161 = vrsqrt.f32 %v237_v47  ;;  %v224_v17 = vmul.f32 0.0078125, %v207_v9 }
 0x16b   :  { %v1150_v32 = vpop.eup %1149  ;;  %1163 = vrsqrt.f32 %v236_v53  ;;  %v1125_v53 = vld [vmem:[#allocation8 + $0x78] sm:$0xff]  }
 0x16c   :  { %469 = vmatmul.mubr.bf16.vlgmr.msra.gmra.mxu0 %v320_v14  ;;  %v1152_v39 = vpop.eup %1151  ;;  %v307_v23 = vadd.f32 %v1518_v20, %v284_v33  ;;  %v263_v30 = vmul.f32 %v1150_v32, %v1453_v38  ;;  %v223_v38 = vmul.f32 0.0078125, %v205_v51  ;;  %v240_v26 = vadd.f32 1e-05, %v224_v17  ;;  %1027 = vmatprep.subr.bf16.mxu1 %v1125_v53 }
 0x16d   :  { %478 = vmatprep.mubr.bf16.mxu0 %v1353_v36  ;;  %v262_v44 = vmul.f32 %v1152_v39, %v1451_v37  ;;  %v209_v4 = vpop.xlane.xlu1 %208 }
 0x16e   :  { %v321_v48 = vpack.c.bf16 %v307_v23, %v306_v43  ;;  %v286_v49 = vmul.f32 %v1514_v5, %v263_v30  ;;  %v239_v62 = vadd.f32 1e-05, %v223_v38  ;;  %v1130_v38 = vld [vmem:[#allocation8 + $0x28] sm:$0xff]  }
 0x16f   :  { %v1154_v50 = vpop.eup %1153  ;;  %v285_v54 = vmul.f32 %v1514_v5, %v262_v44 }
 0x170   :  { %v1156_v52 = vpop.eup %1155  ;;  %v309_v58 = vadd.f32 %v1518_v20, %v286_v49  ;;  %v265_v37 = vmul.f32 %v1154_v50, %v1461_v46  ;;  %1165 = vrsqrt.f32 %v239_v62  ;;  %v225_v46 = vmul.f32 0.0078125, %v209_v4  ;;  %v1139_v62 = vld [vmem:[#allocation8 + $0x40] sm:$0xff]  }
 0x171   :  { %v308_v60 = vadd.f32 %v1518_v20, %v285_v54  ;;  %v264_v61 = vmul.f32 %v1156_v52, %v1459_v45  ;;  %1167 = vrsqrt.f32 %v238_v6  ;;  %v1127_v54 = vld [vmem:[#allocation8 + $0x70] sm:$0xff]   ;;  %v344_v6 = vld [vmem:[%s1738_s4] sm:$0x3] }
 0x172   :  { %v288_v2 = vmul.f32 %v1514_v5, %v265_v37  ;;  %v241_v21 = vadd.f32 1e-05, %v225_v46  ;;  %v1135_v37 = vld [vmem:[#allocation8 + $0x50] sm:$0xff]  }
 0x173   :  { %v322_v63 = vpack.c.bf16 %v309_v58, %v308_v60  ;;  %v1158_v3 = vpop.eup %1157  ;;  %v287_v7 = vmul.f32 %v1514_v5, %v264_v61  ;;  %v1133_v58 = vld [vmem:[#allocation8 + $0x58] sm:$0xff]   ;;  %v1137_v60 = vld [vmem:[#allocation8 + $0x48] sm:$0xff]  }
 0x174   :  { %479 = vmatmul.mubr.bf16.gmra.mxu0 %v321_v48  ;;  %v1160_v8 = vpop.eup %1159  ;;  %v311_v16 = vadd.f32 %v1518_v20, %v288_v2  ;;  %v267_v45 = vmul.f32 %v1158_v3, %v1471_v56  ;;  %1169 = vrsqrt.f32 %v241_v21  ;;  %v1138_v61 = vld [vmem:[#allocation8 + $0x8] sm:$0xff]   ;;  %v346_v2 = vlaneseq }
 0x175   :  { %488 = vmatprep.mubr.bf16.mxu0 %v1353_v36  ;;  %v310_v18 = vadd.f32 %v1518_v20, %v287_v7  ;;  %v266_v19 = vmul.f32 %v1160_v8, %v1468_v55  ;;  %1171 = vrsqrt.f32 %v240_v26 }
 0x176   :  { %v290_v24 = vmul.f32 %v1514_v5, %v267_v45  ;;  %v347_v3 = vshrl.u32 %v346_v2, 7 }
 0x177   :  { %v323_v22 = vpack.c.bf16 %v311_v16, %v310_v18  ;;  %v1162_v12 = vpop.eup %1161  ;;  %v289_v27 = vmul.f32 %v1514_v5, %v266_v19 }
 0x178   :  { %v1164_v28 = vpop.eup %1163  ;;  %v313_v56 = vadd.f32 %v1518_v20, %v290_v24  ;;  %v269_v29 = vmul.f32 %v1162_v12, %v1481_v1  ;;  %v348_v4 = vsub.s32 0, %v347_v3  ;;  %v352_v7 = vsub.s32 1, %v347_v3 }
 0x179   :  { %v312_v55 = vadd.f32 %v1518_v20, %v289_v27  ;;  %v268_v31 = vmul.f32 %v1164_v28, %v1478_v0 }
 0x17a   :  { %v292_v32 = vmul.f32 %v1514_v5, %v269_v29  ;;  %v1575_v8 = vrot.slane %v344_v6, %v348_v4  ;;  %v1577_v9 = vrot.slane %v344_v6, %v352_v7 }
 0x17b   :  { %v324_v14 = vpack.c.bf16 %v313_v56, %v312_v55  ;;  %v291_v33 = vmul.f32 %v1514_v5, %v268_v31 }
 0x17c   :  { %489 = vmatmul.mubr.bf16.gmra.mxu0 %v322_v63  ;;  %v315_v35 = vadd.f32 %v1518_v20, %v292_v32  ;;  %v1140_v63 = vld [vmem:[#allocation8] sm:$0xff]  }
 0x17d   :  { %498 = vmatprep.mubr.bf16.mxu0 %v1353_v36  ;;  %v1166_v15 = vpop.eup %1165  ;;  %v314_v1 = vadd.f32 %v1518_v20, %v291_v33 }
 0x17e   :  { %v1168_v34 = vpop.eup %1167  ;;  %v271_v39 = vmul.f32 %v1166_v15, %v1491_v11 }
 0x17f   :  { %v270_v40 = vmul.f32 %v1168_v34, %v1488_v10  ;;  %v325_v41 = vpack.c.bf16 %v315_v35, %v314_v1 }
 0x180   :  { %v294_v0 = vmul.f32 %v1514_v5, %v271_v39 }
 0x181   :  { %v1170_v23 = vpop.eup %1169  ;;  %v293_v30 = vmul.f32 %v1514_v5, %v270_v40 }
 0x182   :  { %v1172_v42 = vpop.eup %1171  ;;  %v317_v43 = vadd.f32 %v1518_v20, %v294_v0  ;;  %v273_v44 = vmul.f32 %v1170_v23, %v1501_v13  ;;  %v1126_v13 = vld [vmem:[#allocation8 + $0x38] sm:$0xff]  }
 0x183   :  { %v316_v11 = vadd.f32 %v1518_v20, %v293_v30  ;;  %v272_v47 = vmul.f32 %v1172_v42, %v1498_v25  ;;  %1028 = vmatpush3.bf16.msra.mxu1 %v1126_v13  ;;  %v1128_v25 = vld [vmem:[#allocation8 + $0x30] sm:$0xff]  }
 0x184   :  { %499 = vmatmul.mubr.bf16.gmra.mxu0 %v323_v22  ;;  %v296_v10 = vmul.f32 %v1514_v5, %v273_v44  ;;  %1029 = vmatprep.subr.bf16.mxu1 %v1127_v54 }
 0x185   :  { %508 = vmatprep.mubr.bf16.mxu0 %v1353_v36  ;;  %v326_v48 = vpack.c.bf16 %v317_v43, %v316_v11  ;;  %v295_v49 = vmul.f32 %v1514_v5, %v272_v47  ;;  %v1131_v5 = vld [vmem:[#allocation8 + $0x60] sm:$0xff]  }
 0x186   :  { %v319_v50 = vadd.f32 %v1518_v20, %v296_v10 }
 0x187   :  { %v318_v51 = vadd.f32 %v1518_v20, %v295_v49  ;;  %1030 = vmatpush3.bf16.msra.mxu1 %v1128_v25  ;;  %v1134_v20 = vld [vmem:[#allocation8 + $0x18] sm:$0xff]  }
 0x188   :  { %1031 = vmatprep.subr.bf16.mxu1 %v1129_v57 }
 0x189   :  { %v327_v52 = vpack.c.bf16 %v319_v50, %v318_v51 }
 0x18b   :  { %1032 = vmatpush3.bf16.msra.mxu1 %v1130_v38 }
 0x18c   :  { %509 = vmatmul.mubr.bf16.gmra.mxu0 %v324_v14  ;;  %1033 = vmatprep.subr.bf16.mxu1 %v1131_v5 }
 0x18d   :  { %518 = vmatprep.mubr.bf16.mxu0 %v1353_v36 }
 0x194   :  { %519 = vmatmul.mubr.bf16.gmra.mxu0 %v325_v41 }
 0x195   :  { %528 = vmatprep.mubr.bf16.mxu0 %v1353_v36 }
 0x19c   :  { %529 = vmatmul.mubr.bf16.gmra.mxu0 %v326_v48 }
 0x19d   :  { %538 = vmatprep.mubr.bf16.mxu0 %v1353_v36  ;;  %v1132_v36 = vld [vmem:[#allocation8 + $0x20] sm:$0xff]  }
 0x19e   :  { %1034 = vmatpush3.bf16.msra.mxu1 %v1132_v36 }
 0x19f   :  { %1035 = vmatprep.subr.bf16.mxu1 %v1133_v58 }
 0x1a2   :  { %1036 = vmatpush3.bf16.msra.mxu1 %v1134_v20 }
 0x1a3   :  { %1037 = vmatprep.subr.bf16.mxu1 %v1135_v37 }
 0x1a4   :  { %539 = vmatmul.mubr.bf16.gmra.mxu0 %v327_v52 }
 0x1a6   :  { %1038 = vmatpush3.bf16.msra.mxu1 %v1136_v59 }
 0x1a7   :  { %1039 = vmatprep.subr.bf16.mxu1 %v1137_v60 }
 0x1aa   :  { %1040 = vmatpush3.bf16.msra.mxu1 %v1138_v61 }
 0x1ab   :  { %1041 = vmatprep.subr.bf16.mxu1 %v1139_v62 }
 0x1ae   :  { %1042 = vmatpush3.bf16.msra.mxu1 %v1140_v63 }
 0x22c   :  { %v470_v46 = vpop.f32.mrf.mxu0 }
 0x22d   :  { %v471_v16 = vadd.f32 %v470_v46, %v1575_v8 }
 0x22e   :  { %v472_v45 = vpop.f32.mrf.mxu0 }
 0x22f   :  { %v581_v17 = vmul.f32 0.70710677, %v471_v16  ;;  %v473_v18 = vadd.f32 %v472_v45, %v1577_v9  ;;  %v549_v20 = vmul.f32 0.5, %v471_v16 }
 0x230   :  { %v474_v19 = vpop.f32.mrf.mxu0 }
 0x231   :  { %v582_v21 = vmul.f32 0.70710677, %v473_v18  ;;  %v475_v22 = vadd.f32 %v474_v19, %v1575_v8  ;;  %1173 = verf.f32 %v581_v17  ;;  %v550_v57 = vmul.f32 0.5, %v473_v18 }
 0x232   :  { %v476_v24 = vpop.f32.mrf.mxu0 }
 0x233   :  { %v583_v12 = vmul.f32 0.70710677, %v475_v22  ;;  %v477_v26 = vadd.f32 %v476_v24, %v1577_v9  ;;  %1175 = verf.f32 %v582_v21  ;;  %v551_v54 = vmul.f32 0.5, %v475_v22 }
 0x234   :  { %v480_v27 = vpop.f32.mrf.mxu0 }
 0x235   :  { %1177 = verf.f32 %v583_v12  ;;  %v584_v28 = vmul.f32 0.70710677, %v477_v26  ;;  %v1584_v56 = vadd.f32 %v480_v27, %v1575_v8  ;;  %v552_v38 = vmul.f32 0.5, %v477_v26 }
 0x236   :  { %v482_v29 = vpop.f32.mrf.mxu0 }
 0x237   :  { %1179 = verf.f32 %v584_v28  ;;  %v585_v55 = vmul.f32 0.70710677, %v1584_v56  ;;  %v1588_v31 = vadd.f32 %v482_v29, %v1577_v9 }
 0x238   :  { %v484_v14 = vpop.f32.mrf.mxu0 }
 0x239   :  { %v586_v32 = vmul.f32 0.70710677, %v1588_v31  ;;  %v485_v15 = vadd.f32 %v484_v14, %v1575_v8  ;;  %1181 = verf.f32 %v585_v55  ;;  %v553_v14 = vmul.f32 0.5, %v1584_v56 }
 0x23a   :  { %v486_v33 = vpop.f32.mrf.mxu0 }
 0x23b   :  { %v587_v34 = vmul.f32 0.70710677, %v485_v15  ;;  %v487_v35 = vadd.f32 %v486_v33, %v1577_v9  ;;  %1183 = verf.f32 %v586_v32  ;;  %v555_v24 = vmul.f32 0.5, %v485_v15 }
 0x23c   :  { %v490_v39 = vpop.f32.mrf.mxu0  ;;  %v554_v32 = vmul.f32 0.5, %v1588_v31 }
 0x23d   :  { %1185 = verf.f32 %v587_v34  ;;  %v588_v1 = vmul.f32 0.70710677, %v487_v35  ;;  %v1594_v40 = vadd.f32 %v490_v39, %v1575_v8  ;;  %v556_v28 = vmul.f32 0.5, %v487_v35 }
 0x23e   :  { %v492_v41 = vpop.f32.mrf.mxu0  ;;  %v1174_v23 = vpop.eup %1173 }
 0x23f   :  { %1187 = verf.f32 %v588_v1  ;;  %v589_v0 = vmul.f32 0.70710677, %v1594_v40  ;;  %v1598_v30 = vadd.f32 %v492_v41, %v1577_v9  ;;  %v645_v13 = vadd.f32 1.0, %v1174_v23 }
 0x240   :  { %v494_v42 = vpop.f32.mrf.mxu0  ;;  %v1176_v43 = vpop.eup %1175 }
 0x241   :  { %v1601_v44 = vadd.f32 %v494_v42, %v1575_v8  ;;  %v590_v47 = vmul.f32 0.70710677, %v1598_v30  ;;  %1189 = verf.f32 %v589_v0  ;;  %v646_v53 = vadd.f32 1.0, %v1176_v43 }
 0x242   :  { %v1178_v11 = vpop.eup %1177  ;;  %v496_v48 = vpop.f32.mrf.mxu0  ;;  %v677_v4 = vmul.f32 %v645_v13, %v549_v20 }
 0x243   :  { %v647_v10 = vadd.f32 1.0, %v1178_v11  ;;  %v591_v49 = vmul.f32 0.70710677, %v1601_v44  ;;  %v1606_v50 = vadd.f32 %v496_v48, %v1577_v9  ;;  %1191 = verf.f32 %v590_v47 }
 0x244   :  { %v1180_v51 = vpop.eup %1179  ;;  %v500_v52 = vpop.f32.mrf.mxu0  ;;  %v678_v63 = vmul.f32 %v646_v53, %v550_v57  ;;  %v559_v47 = vmul.f32 0.5, %v1601_v44 }
 0x245   :  { %1193 = verf.f32 %v591_v49  ;;  %v592_v25 = vmul.f32 0.70710677, %v1606_v50  ;;  %v1610_v5 = vadd.f32 %v500_v52, %v1575_v8  ;;  %v648_v58 = vadd.f32 1.0, %v1180_v51 }
 0x246   :  { %v502_v36 = vpop.f32.mrf.mxu0  ;;  %v679_v37 = vmul.f32 %v647_v10, %v551_v54  ;;  %v1182_v60 = vpop.eup %1181  ;;  %v560_v54 = vmul.f32 0.5, %v1606_v50  ;;  %v557_v50 = vmul.f32 0.5, %v1594_v40 }
 0x247   :  { %1195 = verf.f32 %v592_v25  ;;  %v1613_v59 = vadd.f32 %v502_v36, %v1577_v9  ;;  %v593_v61 = vmul.f32 0.70710677, %v1610_v5  ;;  %v680_v2 = vmul.f32 %v648_v58, %v552_v38 }
 0x248   :  { %v504_v62 = vpop.f32.mrf.mxu0  ;;  %v1184_v3 = vpop.eup %1183  ;;  %v709_v19 = vpack.c.bf16 %v679_v37, %v677_v4  ;;  %v649_v27 = vadd.f32 1.0, %v1182_v60  ;;  %v558_v58 = vmul.f32 0.5, %v1598_v30 }
 0x249   :  { %v594_v6 = vmul.f32 0.70710677, %v1613_v59  ;;  %v1618_v46 = vadd.f32 %v504_v62, %v1575_v8  ;;  %v710_v45 = vpack.c.bf16 %v680_v2, %v678_v63  ;;  %v650_v22 = vadd.f32 1.0, %v1184_v3 }
 0x24a   :  { %v1186_v7 = vpop.eup %1185  ;;  %v506_v16 = vpop.f32.mrf.mxu0  ;;  %v681_v56 = vmul.f32 %v649_v27, %v553_v14 }
 0x24b   :  { %v651_v17 = vadd.f32 1.0, %v1186_v7  ;;  %1197 = verf.f32 %v594_v6  ;;  %v1621_v18 = vadd.f32 %v506_v16, %v1577_v9  ;;  %v595_v12 = vmul.f32 0.70710677, %v1618_v46  ;;  %892 = vmatprep.mubr.bf16.mxu1 %v710_v45 }
 0x24c   :  { %v1188_v21 = vpop.eup %1187  ;;  %1199 = verf.f32 %v593_v61  ;;  %v510_v26 = vpop.f32.mrf.mxu0  ;;  %893 = vmatmul.mubr.bf16.vlgmr.msra.gmra.mxu1 %v709_v19  ;;  %v682_v41 = vmul.f32 %v650_v22, %v554_v32  ;;  %v562_v16 = vmul.f32 0.5, %v1613_v59  ;;  %v563_v22 = vmul.f32 0.5, %v1618_v46 }
 0x24d   :  { %v652_v29 = vadd.f32 1.0, %v1188_v21  ;;  %v596_v55 = vmul.f32 0.70710677, %v1621_v18  ;;  %1201 = verf.f32 %v595_v12  ;;  %v1628_v33 = vadd.f32 %v510_v26, %v1575_v8 }
 0x24e   :  { %v512_v15 = vpop.f32.mrf.mxu0  ;;  %v683_v34 = vmul.f32 %v651_v17, %v555_v24  ;;  %v1190_v35 = vpop.eup %1189 }
 0x24f   :  { %v684_v39 = vmul.f32 %v652_v29, %v556_v28  ;;  %1203 = verf.f32 %v596_v55  ;;  %v1631_v1 = vadd.f32 %v512_v15, %v1577_v9  ;;  %v597_v0 = vmul.f32 0.70710677, %v1628_v33 }
 0x250   :  { %v514_v23 = vpop.f32.mrf.mxu0  ;;  %v1192_v42 = vpop.eup %1191  ;;  %v711_v52 = vpack.c.bf16 %v683_v34, %v681_v56  ;;  %v653_v38 = vadd.f32 1.0, %v1190_v35  ;;  %v564_v29 = vmul.f32 0.5, %v1621_v18  ;;  %v561_v15 = vmul.f32 0.5, %v1610_v5 }
 0x251   :  { %v598_v31 = vmul.f32 0.70710677, %v1631_v1  ;;  %v1636_v43 = vadd.f32 %v514_v23, %v1575_v8  ;;  %v712_v10 = vpack.c.bf16 %v684_v39, %v682_v41  ;;  %1205 = verf.f32 %v597_v0 }
 0x252   :  { %v1194_v11 = vpop.eup %1193  ;;  %v516_v48 = vpop.f32.mrf.mxu0  ;;  %v654_v13 = vadd.f32 1.0, %v1192_v42  ;;  %v685_v6 = vmul.f32 %v653_v38, %v557_v50 }
 0x253   :  { %v655_v49 = vadd.f32 1.0, %v1194_v11  ;;  %v599_v51 = vmul.f32 0.70710677, %v1636_v43  ;;  %1207 = verf.f32 %v598_v31  ;;  %v1642_v25 = vadd.f32 %v516_v48, %v1577_v9  ;;  %900 = vmatprep.mubr.bf16.mxu1 %v712_v10 }
 0x254   :  { %v1196_v53 = vpop.eup %1195  ;;  %v520_v57 = vpop.f32.mrf.mxu0  ;;  %901 = vmatmul.mubr.bf16.gmra.mxu1 %v711_v52  ;;  %v686_v2 = vmul.f32 %v654_v13, %v558_v58 }
 0x255   :  { %v656_v36 = vadd.f32 1.0, %v1196_v53  ;;  %1209 = verf.f32 %v599_v51  ;;  %v1645_v44 = vadd.f32 %v520_v57, %v1575_v8  ;;  %v600_v20 = vmul.f32 0.70710677, %v1642_v25 }
 0x256   :  { %v522_v37 = vpop.f32.mrf.mxu0  ;;  %v687_v60 = vmul.f32 %v655_v49, %v559_v47 }
 0x257   :  { %v688_v61 = vmul.f32 %v656_v36, %v560_v54  ;;  %v1651_v62 = vadd.f32 %v522_v37, %v1577_v9  ;;  %1211 = verf.f32 %v600_v20  ;;  %v601_v7 = vmul.f32 0.70710677, %v1645_v44 }
 0x258   :  { %v1198_v63 = vpop.eup %1197  ;;  %v524_v3 = vpop.f32.mrf.mxu0  ;;  %v713_v12 = vpack.c.bf16 %v687_v60, %v685_v6  ;;  %v567_v36 = vmul.f32 0.5, %v1636_v43  ;;  %v566_v20 = vmul.f32 0.5, %v1631_v1  ;;  %v568_v37 = vmul.f32 0.5, %v1642_v25 }
 0x259   :  { %v1200_v4 = vpop.eup %1199  ;;  %v602_v30 = vmul.f32 0.70710677, %v1651_v62  ;;  %v658_v45 = vadd.f32 1.0, %v1198_v63  ;;  %v1657_v40 = vadd.f32 %v524_v3, %v1575_v8  ;;  %v714_v19 = vpack.c.bf16 %v688_v61, %v686_v2 }
 0x25a   :  { %v526_v17 = vpop.f32.mrf.mxu0  ;;  %v1202_v21 = vpop.eup %1201  ;;  %v657_v27 = vadd.f32 1.0, %v1200_v4  ;;  %v565_v63 = vmul.f32 0.5, %v1628_v33  ;;  %v570_v25 = vmul.f32 0.5, %v1651_v62 }
 0x25b   :  { %1213 = verf.f32 %v602_v30  ;;  %v1661_v24 = vadd.f32 %v526_v17, %v1577_v9  ;;  %v659_v28 = vadd.f32 1.0, %v1202_v21  ;;  %v603_v59 = vmul.f32 0.70710677, %v1657_v40  ;;  %908 = vmatprep.mubr.bf16.mxu1 %v714_v19 }
 0x25c   :  { %v1204_v26 = vpop.eup %1203  ;;  %v530_v55 = vpop.f32.mrf.mxu0  ;;  %1215 = verf.f32 %v601_v7  ;;  %909 = vmatmul.mubr.bf16.gmra.mxu1 %v713_v12  ;;  %v690_v34 = vmul.f32 %v658_v45, %v562_v16  ;;  %v689_v31 = vmul.f32 %v657_v27, %v561_v15  ;;  %v571_v12 = vmul.f32 0.5, %v1657_v40 }
 0x25d   :  { %v660_v14 = vadd.f32 1.0, %v1204_v26  ;;  %v604_v32 = vmul.f32 0.70710677, %v1661_v24  ;;  %v1667_v46 = vadd.f32 %v530_v55, %v1575_v8  ;;  %1217 = verf.f32 %v603_v59 }
 0x25e   :  { %v532_v39 = vpop.f32.mrf.mxu0  ;;  %v691_v35 = vmul.f32 %v659_v28, %v563_v22  ;;  %v1206_v0 = vpop.eup %1205  ;;  %v572_v59 = vmul.f32 0.5, %v1661_v24 }
 0x25f   :  { %v692_v41 = vmul.f32 %v660_v14, %v564_v29  ;;  %1219 = verf.f32 %v604_v32  ;;  %v605_v18 = vmul.f32 0.70710677, %v1667_v46  ;;  %v1672_v23 = vadd.f32 %v532_v39, %v1577_v9 }
 0x260   :  { %v534_v42 = vpop.f32.mrf.mxu0  ;;  %v1208_v56 = vpop.eup %1207  ;;  %v715_v52 = vpack.c.bf16 %v691_v35, %v689_v31  ;;  %v661_v38 = vadd.f32 1.0, %v1206_v0  ;;  %v569_v32 = vmul.f32 0.5, %v1645_v44 }
 0x261   :  { %v1675_v11 = vadd.f32 %v534_v42, %v1575_v8  ;;  %v716_v47 = vpack.c.bf16 %v692_v41, %v690_v34  ;;  %v606_v48 = vmul.f32 0.70710677, %v1672_v23  ;;  %1221 = verf.f32 %v605_v18 }
 0x262   :  { %v1210_v5 = vpop.eup %1209  ;;  %v536_v10 = vpop.f32.mrf.mxu0  ;;  %v662_v53 = vadd.f32 1.0, %v1208_v56  ;;  %v693_v30 = vmul.f32 %v661_v38, %v565_v63  ;;  %v574_v44 = vmul.f32 0.5, %v1672_v23 }
 0x263   :  { %v663_v49 = vadd.f32 1.0, %v1210_v5  ;;  %v607_v51 = vmul.f32 0.70710677, %v1675_v11  ;;  %916 = vmatprep.mubr.bf16.mxu1 %v716_v47  ;;  %1223 = verf.f32 %v606_v48  ;;  %v1680_v13 = vadd.f32 %v536_v10, %v1577_v9 }
 0x264   :  { %v540_v54 = vpop.f32.mrf.mxu0  ;;  %v1212_v57 = vpop.eup %1211  ;;  %917 = vmatmul.mubr.bf16.gmra.mxu1 %v715_v52  ;;  %v694_v4 = vmul.f32 %v662_v53, %v566_v20  ;;  %v575_v47 = vmul.f32 0.5, %v1675_v11  ;;  %v573_v10 = vmul.f32 0.5, %v1667_v46 }
 0x265   :  { %1225 = verf.f32 %v607_v51  ;;  %v1684_v58 = vadd.f32 %v540_v54, %v1575_v8  ;;  %v664_v50 = vadd.f32 1.0, %v1212_v57  ;;  %v608_v60 = vmul.f32 0.70710677, %v1680_v13 }
 0x266   :  { %v542_v61 = vpop.f32.mrf.mxu0  ;;  %v695_v2 = vmul.f32 %v663_v49, %v567_v36  ;;  %v576_v5 = vmul.f32 0.5, %v1680_v13 }
 0x267   :  { %v1691_v3 = vadd.f32 %v542_v61, %v1577_v9  ;;  %v696_v6 = vmul.f32 %v664_v50, %v568_v37  ;;  %1227 = verf.f32 %v608_v60  ;;  %v609_v1 = vmul.f32 0.70710677, %v1684_v58 }
 0x268   :  { %v1214_v43 = vpop.eup %1213  ;;  %v544_v7 = vpop.f32.mrf.mxu0  ;;  %v717_v27 = vpack.c.bf16 %v695_v2, %v693_v30  ;;  %v577_v46 = vmul.f32 0.5, %v1684_v58 }
 0x269   :  { %v1216_v16 = vpop.eup %1215  ;;  %v610_v45 = vmul.f32 0.70710677, %v1691_v3  ;;  %v545_v17 = vadd.f32 %v544_v7, %v1575_v8  ;;  %v718_v19 = vpack.c.bf16 %v696_v6, %v694_v4  ;;  %v666_v22 = vadd.f32 1.0, %v1214_v43 }
 0x26a   :  { %v546_v33 = vpop.f32.mrf.mxu0  ;;  %v1218_v21 = vpop.eup %1217  ;;  %v665_v62 = vadd.f32 1.0, %v1216_v16  ;;  %v578_v11 = vmul.f32 0.5, %v1691_v3  ;;  %v1710_v3 = vld [vmem:[%s1740_s6] ss:$0 sm:$0xff]  ;;  %s1354_s6 = smov [#allocation10]  }
 0x26b   :  { %v547_v26 = vadd.f32 %v546_v33, %v1577_v9  ;;  %v667_v29 = vadd.f32 1.0, %v1218_v21  ;;  %1229 = verf.f32 %v610_v45  ;;  %v611_v55 = vmul.f32 0.70710677, %v545_v17  ;;  %924 = vmatprep.mubr.bf16.mxu1 %v718_v19  ;;  %s978_s26 = sshll.u32 %s1354_s6, 4  ;;  %s979_s26 = int_to_ptr.vmem [resolvable:$true] %s978_s26 }
 0x26c   :  { %v1220_v28 = vpop.eup %1219  ;;  %1231 = verf.f32 %v609_v1  ;;  %925 = vmatmul.mubr.bf16.gmra.mxu1 %v717_v27  ;;  %v698_v15 = vmul.f32 %v666_v22, %v570_v25  ;;  %v697_v35 = vmul.f32 %v665_v62, %v569_v32  ;;  %v579_v13 = vmul.f32 0.5, %v545_v17  ;;  %s1317_s27 = scalar_lea.vmem %s979_s26, 2048  ;;  %p1322_p7 = scmp.lt.s32.totalorder %s979_s26, %s979_s26 }
 0x26d   :  { %v668_v14 = vadd.f32 1.0, %v1220_v28  ;;  %v612_v8 = vmul.f32 0.70710677, %v547_v26  ;;  %1233 = verf.f32 %v611_v55  ;;  %v699_v40 = vmul.f32 %v667_v29, %v571_v12  ;;  %p1318_p6 = scmp.ne.s32.totalorder %s979_s26, %s1317_s27  ;;  %p1323_p8 = scmp.lt.s32.totalorder %s1317_s27, %s1317_s27 }
 0x26e   :  { %v1222_v9 = vpop.eup %1221  ;;  %v580_v61 = vmul.f32 0.5, %v547_v26 }
 0x26f   :  { %v700_v34 = vmul.f32 %v668_v14, %v572_v59  ;;  %1235 = verf.f32 %v612_v8  ;;  %v719_v0 = vpack.c.bf16 %v699_v40, %v697_v35  ;;  %v669_v31 = vadd.f32 1.0, %v1222_v9  ;;  %p1324_p9 = por %p1323_p8, %p1322_p7 }
 0x270   :  { %v1224_v39 = vpop.eup %1223 }
 0x271   :  { %v720_v41 = vpack.c.bf16 %v700_v34, %v698_v15  ;;  %v670_v42 = vadd.f32 1.0, %v1224_v39  ;;  %v701_v54 = vmul.f32 %v669_v31, %v573_v10  ;;  %p1325_p10 = pnand %p1324_p9, %p1318_p6 }
 0x272   :  { %v1226_v24 = vpop.eup %1225 }
 0x273   :  { %v671_v18 = vadd.f32 1.0, %v1226_v24  ;;  %932 = vmatprep.mubr.bf16.mxu1 %v720_v41  ;;  %v702_v51 = vmul.f32 %v670_v42, %v574_v44 }
 0x274   :  { %v1228_v56 = vpop.eup %1227  ;;  %933 = vmatmul.mubr.bf16.gmra.mxu1 %v719_v0 }
 0x275   :  { %v672_v48 = vadd.f32 1.0, %v1228_v56  ;;  %v703_v49 = vmul.f32 %v671_v18, %v575_v47 }
 0x277   :  { %v704_v52 = vmul.f32 %v672_v48, %v576_v5  ;;  %v721_v37 = vpack.c.bf16 %v703_v49, %v701_v54 }
 0x278   :  { %v1230_v53 = vpop.eup %1229 }
 0x279   :  { %v1232_v57 = vpop.eup %1231  ;;  %v722_v38 = vpack.c.bf16 %v704_v52, %v702_v51  ;;  %v674_v20 = vadd.f32 1.0, %v1230_v53 }
 0x27a   :  { %v1234_v36 = vpop.eup %1233  ;;  %v673_v23 = vadd.f32 1.0, %v1232_v57 }
 0x27b   :  { %v675_v60 = vadd.f32 1.0, %v1234_v36  ;;  %940 = vmatprep.mubr.bf16.mxu1 %v722_v38  ;;  %v706_v2 = vmul.f32 %v674_v20, %v578_v11 }
 0x27c   :  { %v1236_v50 = vpop.eup %1235  ;;  %941 = vmatmul.mubr.bf16.gmra.mxu1 %v721_v37  ;;  %v705_v6 = vmul.f32 %v673_v23, %v577_v46 }
 0x27d   :  { %v676_v63 = vadd.f32 1.0, %v1236_v50  ;;  %v707_v43 = vmul.f32 %v675_v60, %v579_v13 }
 0x27f   :  { %v708_v4 = vmul.f32 %v676_v63, %v580_v61  ;;  %v723_v30 = vpack.c.bf16 %v707_v43, %v705_v6 }
 0x281   :  { %v724_v7 = vpack.c.bf16 %v708_v4, %v706_v2 }
 0x283   :  { %948 = vmatprep.mubr.bf16.mxu1 %v724_v7 }
 0x284   :  { %949 = vmatmul.mubr.bf16.gmra.mxu1 %v723_v30 }
 0x30c   :  { %v1043_v1 = vpop.f32.mrf.mxu1 }
 0x30e   :  { %v1044_v16 = vpop.f32.mrf.mxu1 }
 0x30f   :  { %v1045_v25 = vadd.f32 %v1044_v16, %v1043_v1 }
 0x310   :  { %v1046_v45 = vpop.f32.mrf.mxu1 }
 0x311   :  { %v895_v17 = vadd.f32 %v1045_v25, %v1710_v3 }
 0x312   :  { %v1047_v58 = vpop.f32.mrf.mxu1 }
 0x313   :  { %957 = vst [vmem:[#allocation10] sm:$0xff] %v895_v17  ;;  %v1048_v33 = vadd.f32 %v1047_v58, %v1046_v45 }
 0x314   :  { %v1049_v19 = vpop.f32.mrf.mxu1 }
 0x315   :  { %v898_v21 = vadd.f32 %v1048_v33, %v1710_v3 }
 0x316   :  { %v1050_v22 = vpop.f32.mrf.mxu1 }
 0x317   :  { %958 = vst [vmem:[#allocation10 + $0x8] sm:$0xff] %v898_v21  ;;  %v1051_v12 = vadd.f32 %v1050_v22, %v1049_v19 }
 0x318   :  { %v1052_v26 = vpop.f32.mrf.mxu1 }
 0x319   :  { %v903_v27 = vadd.f32 %v1051_v12, %v1710_v3 }
 0x31a   :  { %v1053_v28 = vpop.f32.mrf.mxu1 }
 0x31b   :  { %959 = vst [vmem:[#allocation10 + $0x10] sm:$0xff] %v903_v27  ;;  %v1054_v29 = vadd.f32 %v1053_v28, %v1052_v26 }
 0x31c   :  { %v1055_v59 = vpop.f32.mrf.mxu1 }
 0x31d   :  { %v906_v55 = vadd.f32 %v1054_v29, %v1710_v3 }
 0x31e   :  { %v1056_v62 = vpop.f32.mrf.mxu1 }
 0x31f   :  { %960 = vst [vmem:[#allocation10 + $0x18] sm:$0xff] %v906_v55  ;;  %v1057_v14 = vadd.f32 %v1056_v62, %v1055_v59 }
 0x320   :  { %v1058_v8 = vpop.f32.mrf.mxu1 }
 0x321   :  { %v911_v32 = vadd.f32 %v1057_v14, %v1710_v3 }
 0x322   :  { %v1059_v15 = vpop.f32.mrf.mxu1 }
 0x323   :  { %961 = vst [vmem:[#allocation10 + $0x20] sm:$0xff] %v911_v32  ;;  %v1060_v40 = vadd.f32 %v1059_v15, %v1058_v8 }
 0x324   :  { %v1061_v34 = vpop.f32.mrf.mxu1 }
 0x325   :  { %v914_v9 = vadd.f32 %v1060_v40, %v1710_v3 }
 0x326   :  { %v1062_v39 = vpop.f32.mrf.mxu1 }
 0x327   :  { %962 = vst [vmem:[#allocation10 + $0x28] sm:$0xff] %v914_v9  ;;  %v1063_v35 = vadd.f32 %v1062_v39, %v1061_v34 }
 0x328   :  { %v1064_v41 = vpop.f32.mrf.mxu1 }
 0x329   :  { %v919_v24 = vadd.f32 %v1063_v35, %v1710_v3 }
 0x32a   :  { %v1065_v18 = vpop.f32.mrf.mxu1 }
 0x32b   :  { %963 = vst [vmem:[#allocation10 + $0x30] sm:$0xff] %v919_v24  ;;  %v1066_v0 = vadd.f32 %v1065_v18, %v1064_v41 }
 0x32c   :  { %v1067_v42 = vpop.f32.mrf.mxu1 }
 0x32d   :  { %v922_v56 = vadd.f32 %v1066_v0, %v1710_v3 }
 0x32e   :  { %v1068_v31 = vpop.f32.mrf.mxu1 }
 0x32f   :  { %964 = vst [vmem:[#allocation10 + $0x38] sm:$0xff] %v922_v56  ;;  %v1069_v47 = vadd.f32 %v1068_v31, %v1067_v42 }
 0x330   :  { %v1070_v44 = vpop.f32.mrf.mxu1 }
 0x331   :  { %v927_v5 = vadd.f32 %v1069_v47, %v1710_v3 }
 0x332   :  { %v1071_v48 = vpop.f32.mrf.mxu1 }
 0x333   :  { %965 = vst [vmem:[#allocation10 + $0x40] sm:$0xff] %v927_v5  ;;  %v1072_v10 = vadd.f32 %v1071_v48, %v1070_v44 }
 0x334   :  { %v1073_v49 = vpop.f32.mrf.mxu1 }
 0x335   :  { %v930_v51 = vadd.f32 %v1072_v10, %v1710_v3 }
 0x336   :  { %v1074_v52 = vpop.f32.mrf.mxu1 }
 0x337   :  { %966 = vst [vmem:[#allocation10 + $0x48] sm:$0xff] %v930_v51  ;;  %v1075_v53 = vadd.f32 %v1074_v52, %v1073_v49 }
 0x338   :  { %v1076_v54 = vpop.f32.mrf.mxu1 }
 0x339   :  { %v935_v57 = vadd.f32 %v1075_v53, %v1710_v3 }
 0x33a   :  { %v1077_v38 = vpop.f32.mrf.mxu1 }
 0x33b   :  { %967 = vst [vmem:[#allocation10 + $0x50] sm:$0xff] %v935_v57  ;;  %v1078_v36 = vadd.f32 %v1077_v38, %v1076_v54 }
 0x33c   :  { %v1079_v20 = vpop.f32.mrf.mxu1 }
 0x33d   :  { %v938_v37 = vadd.f32 %v1078_v36, %v1710_v3 }
 0x33e   :  { %v1080_v50 = vpop.f32.mrf.mxu1 }
 0x33f   :  { %968 = vst [vmem:[#allocation10 + $0x58] sm:$0xff] %v938_v37  ;;  %v1081_v11 = vadd.f32 %v1080_v50, %v1079_v20 }
 0x340   :  { %v1082_v60 = vpop.f32.mrf.mxu1 }
 0x341   :  { %v943_v23 = vadd.f32 %v1081_v11, %v1710_v3 }
 0x342   :  { %v1083_v13 = vpop.f32.mrf.mxu1 }
 0x343   :  { %969 = vst [vmem:[#allocation10 + $0x60] sm:$0xff] %v943_v23  ;;  %v1084_v61 = vadd.f32 %v1083_v13, %v1082_v60 }
 0x344   :  { %v1085_v63 = vpop.f32.mrf.mxu1 }
 0x345   :  { %v946_v46 = vadd.f32 %v1084_v61, %v1710_v3 }
 0x346   :  { %v1086_v2 = vpop.f32.mrf.mxu1 }
 0x347   :  { %970 = vst [vmem:[#allocation10 + $0x68] sm:$0xff] %v946_v46  ;;  %v1087_v43 = vadd.f32 %v1086_v2, %v1085_v63 }
 0x348   :  { %v1088_v4 = vpop.f32.mrf.mxu1 }
 0x349   :  { %v951_v6 = vadd.f32 %v1087_v43, %v1710_v3 }
 0x34a   :  { %v1089_v7 = vpop.f32.mrf.mxu1 }
 0x34b   :  { %971 = vst [vmem:[#allocation10 + $0x70] sm:$0xff] %v951_v6  ;;  %v1090_v30 = vadd.f32 %v1089_v7, %v1088_v4 }
 0x34d   :  { %v954_v1 = vadd.f32 %v1090_v30, %v1710_v3 }
 0x34f   :  { %972 = vst [vmem:[#allocation10 + $0x78] sm:$0xff] %v954_v1 }
 0x350   :  { %1328 = shalt.err (!%p1325_p10)
}
 0x351   :  { %984 = dma.vmem_to_hbm [thread:$0]  %s979_s26, 2048, %s1741_s7, [#allocation4], %s1347_s10, %s1347_s10, %s1348_s11  }
 0x352   :  { %1343 = dma.done.wait [#allocation4], 2048  }
 0x353   :  { %1344 = vsyncadd [#allocation4], 4294965248 }
 0x354   :  { %988 = vsyncpa [#allocation3], 1 }
 0x355   :  { %989 = vsyncpa [#allocation6], 1 }
 0x356   :  { %990 = vsyncpa [#allocation9], 1 }
 0x357   :  { %991 = vsyncpa [#allocation4], 1 }

</bundles_post_ra>
